<compile_context>
chip_gen: v6e
topology: v6e:2x2x1
jax: 0.10.0
libtpu: 0.0.40
codegen_flags: <defaults>
</compile_context>

<pallas_src>
import functools

import jax
import jax.numpy as jnp
import numpy as np
from jax import lax
from jax.experimental import pallas as pl
from jax.experimental.pallas import tpu as pltpu

_ROW_CHUNK = 8            # sublane-aligned row chunk for the fused epilogue
_MAX_STATIC_CHUNKS = 16   # unroll the chunk loop when it is short


def _gaussian_chunk(x_ref, m_ref, xct, start, rows, *, dist_mult,
                    clip_value_low):
    """dm for `rows` query rows starting at `start` against all P columns.

    xct is the masked, transposed point block (BB, F, P); the row operand is
    (re)loaded and masked from the refs so `start` may be dynamic.
    Returns (BB, rows, P) float32."""
    n_features = xct.shape[1]
    xr = (x_ref[:, pl.ds(start, rows), :].astype(jnp.float32) *
          m_ref[:, pl.ds(start, rows), :].astype(jnp.float32))     # (BB,rows,F)

    # Exact per-feature accumulation on the VPU: no MXU, no cancellation at
    # d2 ~ 0 (coincident / masked-out points).
    # TODO(synk): for very large F (> ~128) switch this static unroll to a
    # fori_loop over feature slabs to bound code size.
    d2 = None
    for f in range(n_features):
        diff = xr[:, :, f:f + 1] - xct[:, f:f + 1, :]               # (BB,rows,P)
        sq = diff * diff
        d2 = sq if d2 is None else d2 + sq

    d = jnp.sqrt(jnp.clip(d2, 1e-06, 1e06))
    dm = jnp.exp((-dist_mult) * d)
    # Static clip specialization (torch.clip(dm, low, 1) == min(max(dm, low), 1)).
    if clip_value_low > 0.0:
        dm = jnp.maximum(dm, clip_value_low)
    if dist_mult < 0.0 or clip_value_low > 1.0:
        dm = jnp.minimum(dm, 1.0)
    return dm


def _gaussian_kernel_body(x_ref, m_ref, o_ref, *, dist_mult, clip_value_low,
                          row_chunk):
    # x_ref: (BB, P, F), m_ref: (BB, P, 1), o_ref: (BB, P, P)
    p = x_ref.shape[1]
    # Masked points and their transpose (the "column" operand of the distance
    # matrix) are computed once per grid step and reused by every row chunk.
    xc = x_ref[...].astype(jnp.float32) * m_ref[...].astype(jnp.float32)
    xct = jnp.swapaxes(xc, 1, 2)                                    # (BB, F, P)

    kwargs = dict(dist_mult=dist_mult, clip_value_low=clip_value_low)
    n_chunks = p // row_chunk

    if n_chunks <= _MAX_STATIC_CHUNKS:
        for c in range(n_chunks):                  # short: static unroll
            start = c * row_chunk
            dm = _gaussian_chunk(x_ref, m_ref, xct, start, row_chunk, **kwargs)
            o_ref[:, pl.ds(start, row_chunk), :] = dm.astype(o_ref.dtype)
    else:
        def body(c, carry):                        # long: visible loop
            start = pl.multiple_of(c * row_chunk, row_chunk)
            dm = _gaussian_chunk(x_ref, m_ref, xct, start, row_chunk, **kwargs)
            o_ref[:, pl.ds(start, row_chunk), :] = dm.astype(o_ref.dtype)
            return carry
        lax.fori_loop(0, n_chunks, body, 0)


def _vmem_limit_bytes():
    """Scoped-VMEM limit derived from the actual part: ~half of physical
    per-core VMEM (32 MiB on v7x's 64 MiB, 64 MiB on v5e/v6e's 128 MiB)."""
    cap = 128 * 1024 * 1024
    try:
        info = pltpu.get_tpu_info()
        cap = int(getattr(info, "vmem_capacity_bytes", cap)) or cap
    except Exception:
        pass
    return int(max(16 * 1024 * 1024, min(cap // 2, 64 * 1024 * 1024)))


def _pick_blocks(G, P, F, itemsize=4):
    """Pick (bins_per_block, row_chunk, vmem_limit_bytes)."""
    vmem_limit = _vmem_limit_bytes()
    budget = vmem_limit // 2          # headroom for Mosaic-internal scratch

    row_chunk = _ROW_CHUNK if P % _ROW_CHUNK == 0 else P

    # Per-bin footprint of one grid step: double-buffered in/out blocks plus
    # the in-kernel temporaries (masked x, its transpose, per-chunk working
    # set of diff/d2/d/dm).
    per_bin = itemsize * (
        2 * (P * F + P)          # input blocks (x, msk), double-buffered
        + 2 * (P * P)            # output block, double-buffered
        + 2 * (P * F)            # xc and xct values
        + 4 * (row_chunk * P)    # per-chunk diff/d2/d/dm working set
    )
    bb_max = int(max(1, min(G, budget // per_bin)))

    def steps(bb):
        return -(-G // bb)

    # Prefer a block size that divides G (no padding); among those prefer an
    # even step count >= 2 (balanced split of the "parallel" axis across
    # v7x's two TensorCores), then the largest block (amortizes the ~0.35us
    # per-grid-step overhead and keeps DMAs well above sub-KB sizes).
    divisors = [d for d in range(1, G + 1) if G % d == 0 and d <= bb_max]
    bb = max(divisors, key=lambda d: (steps(d) >= 2 and steps(d) % 2 == 0,
                                      steps(d) >= 2, d))

    # Awkward G (e.g. prime): zero-pad the bins axis instead of collapsing
    # the block down to a tiny divisor.
    if G > bb_max and bb * 4 <= bb_max:
        bb = bb_max
        if steps(bb) > 1 and steps(bb) % 2 == 1:
            bb = max(1, -(-G // (steps(bb) + 1)))
    return bb, row_chunk, vmem_limit


def node_pair_gaussian_kernel(x_msg_binned, msk, *, dist_mult=0.1,
                              clip_value_low=0.0, out_dtype=None):
    """x_msg_binned: (B, NB, P, F), msk: (B, NB, P, 1) ->
       (B, NB, P, P, 1) message matrix."""
    B, NB, P, F = x_msg_binned.shape
    G = B * NB
    out_dtype = x_msg_binned.dtype if out_dtype is None else jnp.dtype(out_dtype)

    x_flat = x_msg_binned.reshape(G, P, F)
    m_flat = msk.reshape(G, P, 1)

    bb, row_chunk, vmem_limit = _pick_blocks(G, P, F)
    nbb = -(-G // bb)
    g_pad = nbb * bb
    if g_pad != G:   # padded bins are all-zero and sliced off below
        x_flat = jnp.pad(x_flat, ((0, g_pad - G), (0, 0), (0, 0)))
        m_flat = jnp.pad(m_flat, ((0, g_pad - G), (0, 0), (0, 0)))

    kernel = functools.partial(
        _gaussian_kernel_body,
        dist_mult=float(dist_mult),
        clip_value_low=float(clip_value_low),
        row_chunk=row_chunk,
    )

    out_flat = pl.pallas_call(
        kernel,
        out_shape=jax.ShapeDtypeStruct((g_pad, P, P), out_dtype),
        grid_spec=pltpu.PrefetchScalarGridSpec(
            num_scalar_prefetch=0,
            grid=(nbb,),
            in_specs=[
                pl.BlockSpec((bb, P, F), lambda i: (i, 0, 0)),
                pl.BlockSpec((bb, P, 1), lambda i: (i, 0, 0)),
            ],
            out_specs=pl.BlockSpec((bb, P, P), lambda i: (i, 0, 0)),
        ),
        compiler_params=pltpu.CompilerParams(
            dimension_semantics=("parallel",),
            vmem_limit_bytes=vmem_limit,
        ),
    )(x_flat, m_flat)

    if g_pad != G:
        out_flat = out_flat[:G]
    return out_flat.reshape(B, NB, P, P, 1)


def _reference_np64(x_msg_binned, msk, *, dist_mult=0.1, clip_value_low=0.0):
    """Float64 NumPy reference mirroring the PyTorch module formula."""
    x = np.asarray(x_msg_binned, np.float64) * np.asarray(msk, np.float64)
    na = np.sum(np.square(x), -1)[..., :, None]
    nb = np.sum(np.square(x), -1)[..., None, :]
    g = np.einsum("...pf,...qf->...pq", x, x)
    d = np.sqrt(np.clip(na - 2.0 * g + nb, 1e-06, 1e06))
    dm = np.exp(-dist_mult * d)[..., None]
    return np.clip(dm, clip_value_low, 1.0)


if __name__ == "__main__":
    # (n_batch, n_bins, n_points, n_msg_features)
    B, NB, P, F = 2, 4, 16, 8
    key = jax.random.PRNGKey(0)
    kx, km = jax.random.split(key)
    x_msg_binned = jax.random.normal(kx, (B, NB, P, F), dtype=jnp.float32)
    # binary point mask, shape (B, NB, P, 1), broadcast over features
    msk = (jax.random.uniform(km, (B, NB, P, 1)) > 0.2).astype(jnp.float32)

    out = node_pair_gaussian_kernel(x_msg_binned, msk,
                                    dist_mult=0.1, clip_value_low=0.0)
    out = jax.block_until_ready(out)

    ref = _reference_np64(np.asarray(x_msg_binned), np.asarray(msk),
                          dist_mult=0.1, clip_value_low=0.0)
    assert out.shape == (B, NB, P, P, 1), out.shape
    err = float(np.max(np.abs(np.asarray(out, dtype=np.float64) - ref)))
    assert err < 3e-5, err

    print("KERNEL_OK")
</pallas_src>

<mosaic_0001>
module attributes {stable_mosaic.version = 11 : i64} {
  func.func @_gaussian_kernel_body(%arg0: i32, %arg1: memref<4x16x8xf32, #tpu.memory_space<vmem>>, %arg2: memref<4x16x1xf32, #tpu.memory_space<vmem>>, %arg3: memref<4x16x16xf32, #tpu.memory_space<vmem>>) attributes {dimension_semantics = [#tpu.dimension_semantics<parallel>], iteration_bounds = array<i64: 2>, scalar_prefetch = 0 : i64, scratch_operands = 0 : i64, tpu.core_type = #tpu.core_type<tc>, window_params = [{transform_indices = @transform_0, window_bounds = array<i64: 4, 16, 8>}, {transform_indices = @transform_1, window_bounds = array<i64: 4, 16, 1>}, {transform_indices = @transform_2, window_bounds = array<i64: 4, 16, 16>}]} {
    %c0 = arith.constant 0 : index
    %c0_0 = arith.constant 0 : index
    %c0_1 = arith.constant 0 : index
    %0 = vector.load %arg1[%c0, %c0_0, %c0_1] : memref<4x16x8xf32, #tpu.memory_space<vmem>>, vector<4x16x8xf32>
    %c0_2 = arith.constant 0 : index
    %c0_3 = arith.constant 0 : index
    %c0_4 = arith.constant 0 : index
    %1 = vector.load %arg2[%c0_2, %c0_3, %c0_4] : memref<4x16x1xf32, #tpu.memory_space<vmem>>, vector<4x16x1xf32>
    %2 = vector.broadcast %1 : vector<4x16x1xf32> to vector<4x16x8xf32>
    %3 = arith.mulf %0, %2 : vector<4x16x8xf32>
    %4 = tpu.transpose %3, [0, 2, 1] : vector<4x16x8xf32> -> vector<4x8x16xf32>
    %c0_5 = arith.constant 0 : index
    %c0_6 = arith.constant 0 : index
    %c0_7 = arith.constant 0 : index
    %5 = vector.load %arg1[%c0_5, %c0_6, %c0_7] : memref<4x16x8xf32, #tpu.memory_space<vmem>>, vector<4x8x8xf32>
    %c0_8 = arith.constant 0 : index
    %c0_9 = arith.constant 0 : index
    %c0_10 = arith.constant 0 : index
    %6 = vector.load %arg2[%c0_8, %c0_9, %c0_10] : memref<4x16x1xf32, #tpu.memory_space<vmem>>, vector<4x8x1xf32>
    %7 = vector.broadcast %6 : vector<4x8x1xf32> to vector<4x8x8xf32>
    %8 = arith.mulf %5, %7 : vector<4x8x8xf32>
    %9 = vector.extract_strided_slice %8 {offsets = [0, 0, 0], sizes = [4, 8, 1], strides = [1, 1, 1]} : vector<4x8x8xf32> to vector<4x8x1xf32>
    %10 = vector.extract_strided_slice %4 {offsets = [0, 0, 0], sizes = [4, 1, 16], strides = [1, 1, 1]} : vector<4x8x16xf32> to vector<4x1x16xf32>
    %11 = vector.broadcast %9 : vector<4x8x1xf32> to vector<4x8x16xf32>
    %12 = vector.broadcast %10 : vector<4x1x16xf32> to vector<4x8x16xf32>
    %13 = arith.subf %11, %12 : vector<4x8x16xf32>
    %14 = arith.mulf %13, %13 : vector<4x8x16xf32>
    %15 = vector.extract_strided_slice %8 {offsets = [0, 0, 1], sizes = [4, 8, 1], strides = [1, 1, 1]} : vector<4x8x8xf32> to vector<4x8x1xf32>
    %16 = vector.extract_strided_slice %4 {offsets = [0, 1, 0], sizes = [4, 1, 16], strides = [1, 1, 1]} : vector<4x8x16xf32> to vector<4x1x16xf32>
    %17 = vector.broadcast %15 : vector<4x8x1xf32> to vector<4x8x16xf32>
    %18 = vector.broadcast %16 : vector<4x1x16xf32> to vector<4x8x16xf32>
    %19 = arith.subf %17, %18 : vector<4x8x16xf32>
    %20 = arith.mulf %19, %19 : vector<4x8x16xf32>
    %21 = arith.addf %14, %20 : vector<4x8x16xf32>
    %22 = vector.extract_strided_slice %8 {offsets = [0, 0, 2], sizes = [4, 8, 1], strides = [1, 1, 1]} : vector<4x8x8xf32> to vector<4x8x1xf32>
    %23 = vector.extract_strided_slice %4 {offsets = [0, 2, 0], sizes = [4, 1, 16], strides = [1, 1, 1]} : vector<4x8x16xf32> to vector<4x1x16xf32>
    %24 = vector.broadcast %22 : vector<4x8x1xf32> to vector<4x8x16xf32>
    %25 = vector.broadcast %23 : vector<4x1x16xf32> to vector<4x8x16xf32>
    %26 = arith.subf %24, %25 : vector<4x8x16xf32>
    %27 = arith.mulf %26, %26 : vector<4x8x16xf32>
    %28 = arith.addf %21, %27 : vector<4x8x16xf32>
    %29 = vector.extract_strided_slice %8 {offsets = [0, 0, 3], sizes = [4, 8, 1], strides = [1, 1, 1]} : vector<4x8x8xf32> to vector<4x8x1xf32>
    %30 = vector.extract_strided_slice %4 {offsets = [0, 3, 0], sizes = [4, 1, 16], strides = [1, 1, 1]} : vector<4x8x16xf32> to vector<4x1x16xf32>
    %31 = vector.broadcast %29 : vector<4x8x1xf32> to vector<4x8x16xf32>
    %32 = vector.broadcast %30 : vector<4x1x16xf32> to vector<4x8x16xf32>
    %33 = arith.subf %31, %32 : vector<4x8x16xf32>
    %34 = arith.mulf %33, %33 : vector<4x8x16xf32>
    %35 = arith.addf %28, %34 : vector<4x8x16xf32>
    %36 = vector.extract_strided_slice %8 {offsets = [0, 0, 4], sizes = [4, 8, 1], strides = [1, 1, 1]} : vector<4x8x8xf32> to vector<4x8x1xf32>
    %37 = vector.extract_strided_slice %4 {offsets = [0, 4, 0], sizes = [4, 1, 16], strides = [1, 1, 1]} : vector<4x8x16xf32> to vector<4x1x16xf32>
    %38 = vector.broadcast %36 : vector<4x8x1xf32> to vector<4x8x16xf32>
    %39 = vector.broadcast %37 : vector<4x1x16xf32> to vector<4x8x16xf32>
    %40 = arith.subf %38, %39 : vector<4x8x16xf32>
    %41 = arith.mulf %40, %40 : vector<4x8x16xf32>
    %42 = arith.addf %35, %41 : vector<4x8x16xf32>
    %43 = vector.extract_strided_slice %8 {offsets = [0, 0, 5], sizes = [4, 8, 1], strides = [1, 1, 1]} : vector<4x8x8xf32> to vector<4x8x1xf32>
    %44 = vector.extract_strided_slice %4 {offsets = [0, 5, 0], sizes = [4, 1, 16], strides = [1, 1, 1]} : vector<4x8x16xf32> to vector<4x1x16xf32>
    %45 = vector.broadcast %43 : vector<4x8x1xf32> to vector<4x8x16xf32>
    %46 = vector.broadcast %44 : vector<4x1x16xf32> to vector<4x8x16xf32>
    %47 = arith.subf %45, %46 : vector<4x8x16xf32>
    %48 = arith.mulf %47, %47 : vector<4x8x16xf32>
    %49 = arith.addf %42, %48 : vector<4x8x16xf32>
    %50 = vector.extract_strided_slice %8 {offsets = [0, 0, 6], sizes = [4, 8, 1], strides = [1, 1, 1]} : vector<4x8x8xf32> to vector<4x8x1xf32>
    %51 = vector.extract_strided_slice %4 {offsets = [0, 6, 0], sizes = [4, 1, 16], strides = [1, 1, 1]} : vector<4x8x16xf32> to vector<4x1x16xf32>
    %52 = vector.broadcast %50 : vector<4x8x1xf32> to vector<4x8x16xf32>
    %53 = vector.broadcast %51 : vector<4x1x16xf32> to vector<4x8x16xf32>
    %54 = arith.subf %52, %53 : vector<4x8x16xf32>
    %55 = arith.mulf %54, %54 : vector<4x8x16xf32>
    %56 = arith.addf %49, %55 : vector<4x8x16xf32>
    %57 = vector.extract_strided_slice %8 {offsets = [0, 0, 7], sizes = [4, 8, 1], strides = [1, 1, 1]} : vector<4x8x8xf32> to vector<4x8x1xf32>
    %58 = vector.extract_strided_slice %4 {offsets = [0, 7, 0], sizes = [4, 1, 16], strides = [1, 1, 1]} : vector<4x8x16xf32> to vector<4x1x16xf32>
    %59 = vector.broadcast %57 : vector<4x8x1xf32> to vector<4x8x16xf32>
    %60 = vector.broadcast %58 : vector<4x1x16xf32> to vector<4x8x16xf32>
    %61 = arith.subf %59, %60 : vector<4x8x16xf32>
    %62 = arith.mulf %61, %61 : vector<4x8x16xf32>
    %63 = arith.addf %56, %62 : vector<4x8x16xf32>
    %cst = arith.constant 9.99999997E-7 : f32
    %cst_11 = arith.constant 1.000000e+06 : f32
    %64 = vector.broadcast %cst : f32 to vector<4x8x16xf32>
    %65 = arith.maximumf %64, %63 : vector<4x8x16xf32>
    %66 = vector.broadcast %cst_11 : f32 to vector<4x8x16xf32>
    %67 = arith.minimumf %66, %65 : vector<4x8x16xf32>
    %68 = math.sqrt %67 : vector<4x8x16xf32>
    %cst_12 = arith.constant -1.000000e-01 : f32
    %69 = vector.broadcast %cst_12 : f32 to vector<4x8x16xf32>
    %70 = arith.mulf %69, %68 : vector<4x8x16xf32>
    %71 = math.exp %70 : vector<4x8x16xf32>
    %c0_13 = arith.constant 0 : index
    %c0_14 = arith.constant 0 : index
    %c0_15 = arith.constant 0 : index
    %72 = vector.load %arg3[%c0_13, %c0_14, %c0_15] : memref<4x16x16xf32, #tpu.memory_space<vmem>>, vector<4x8x16xf32>
    tpu.vector_store %arg3[%c0_13, %c0_14, %c0_15], %71 {strides = array<i32>} : memref<4x16x16xf32, #tpu.memory_space<vmem>>, vector<4x8x16xf32>,
    %c0_16 = arith.constant 0 : index
    %c8 = arith.constant 8 : index
    %c0_17 = arith.constant 0 : index
    %73 = vector.load %arg1[%c0_16, %c8, %c0_17] : memref<4x16x8xf32, #tpu.memory_space<vmem>>, vector<4x8x8xf32>
    %c0_18 = arith.constant 0 : index
    %c8_19 = arith.constant 8 : index
    %c0_20 = arith.constant 0 : index
    %74 = vector.load %arg2[%c0_18, %c8_19, %c0_20] : memref<4x16x1xf32, #tpu.memory_space<vmem>>, vector<4x8x1xf32>
    %75 = vector.broadcast %74 : vector<4x8x1xf32> to vector<4x8x8xf32>
    %76 = arith.mulf %73, %75 : vector<4x8x8xf32>
    %77 = vector.extract_strided_slice %76 {offsets = [0, 0, 0], sizes = [4, 8, 1], strides = [1, 1, 1]} : vector<4x8x8xf32> to vector<4x8x1xf32>
    %78 = vector.extract_strided_slice %4 {offsets = [0, 0, 0], sizes = [4, 1, 16], strides = [1, 1, 1]} : vector<4x8x16xf32> to vector<4x1x16xf32>
    %79 = vector.broadcast %77 : vector<4x8x1xf32> to vector<4x8x16xf32>
    %80 = vector.broadcast %78 : vector<4x1x16xf32> to vector<4x8x16xf32>
    %81 = arith.subf %79, %80 : vector<4x8x16xf32>
    %82 = arith.mulf %81, %81 : vector<4x8x16xf32>
    %83 = vector.extract_strided_slice %76 {offsets = [0, 0, 1], sizes = [4, 8, 1], strides = [1, 1, 1]} : vector<4x8x8xf32> to vector<4x8x1xf32>
    %84 = vector.extract_strided_slice %4 {offsets = [0, 1, 0], sizes = [4, 1, 16], strides = [1, 1, 1]} : vector<4x8x16xf32> to vector<4x1x16xf32>
    %85 = vector.broadcast %83 : vector<4x8x1xf32> to vector<4x8x16xf32>
    %86 = vector.broadcast %84 : vector<4x1x16xf32> to vector<4x8x16xf32>
    %87 = arith.subf %85, %86 : vector<4x8x16xf32>
    %88 = arith.mulf %87, %87 : vector<4x8x16xf32>
    %89 = arith.addf %82, %88 : vector<4x8x16xf32>
    %90 = vector.extract_strided_slice %76 {offsets = [0, 0, 2], sizes = [4, 8, 1], strides = [1, 1, 1]} : vector<4x8x8xf32> to vector<4x8x1xf32>
    %91 = vector.extract_strided_slice %4 {offsets = [0, 2, 0], sizes = [4, 1, 16], strides = [1, 1, 1]} : vector<4x8x16xf32> to vector<4x1x16xf32>
    %92 = vector.broadcast %90 : vector<4x8x1xf32> to vector<4x8x16xf32>
    %93 = vector.broadcast %91 : vector<4x1x16xf32> to vector<4x8x16xf32>
    %94 = arith.subf %92, %93 : vector<4x8x16xf32>
    %95 = arith.mulf %94, %94 : vector<4x8x16xf32>
    %96 = arith.addf %89, %95 : vector<4x8x16xf32>
    %97 = vector.extract_strided_slice %76 {offsets = [0, 0, 3], sizes = [4, 8, 1], strides = [1, 1, 1]} : vector<4x8x8xf32> to vector<4x8x1xf32>
    %98 = vector.extract_strided_slice %4 {offsets = [0, 3, 0], sizes = [4, 1, 16], strides = [1, 1, 1]} : vector<4x8x16xf32> to vector<4x1x16xf32>
    %99 = vector.broadcast %97 : vector<4x8x1xf32> to vector<4x8x16xf32>
    %100 = vector.broadcast %98 : vector<4x1x16xf32> to vector<4x8x16xf32>
    %101 = arith.subf %99, %100 : vector<4x8x16xf32>
    %102 = arith.mulf %101, %101 : vector<4x8x16xf32>
    %103 = arith.addf %96, %102 : vector<4x8x16xf32>
    %104 = vector.extract_strided_slice %76 {offsets = [0, 0, 4], sizes = [4, 8, 1], strides = [1, 1, 1]} : vector<4x8x8xf32> to vector<4x8x1xf32>
    %105 = vector.extract_strided_slice %4 {offsets = [0, 4, 0], sizes = [4, 1, 16], strides = [1, 1, 1]} : vector<4x8x16xf32> to vector<4x1x16xf32>
    %106 = vector.broadcast %104 : vector<4x8x1xf32> to vector<4x8x16xf32>
    %107 = vector.broadcast %105 : vector<4x1x16xf32> to vector<4x8x16xf32>
    %108 = arith.subf %106, %107 : vector<4x8x16xf32>
    %109 = arith.mulf %108, %108 : vector<4x8x16xf32>
    %110 = arith.addf %103, %109 : vector<4x8x16xf32>
    %111 = vector.extract_strided_slice %76 {offsets = [0, 0, 5], sizes = [4, 8, 1], strides = [1, 1, 1]} : vector<4x8x8xf32> to vector<4x8x1xf32>
    %112 = vector.extract_strided_slice %4 {offsets = [0, 5, 0], sizes = [4, 1, 16], strides = [1, 1, 1]} : vector<4x8x16xf32> to vector<4x1x16xf32>
    %113 = vector.broadcast %111 : vector<4x8x1xf32> to vector<4x8x16xf32>
    %114 = vector.broadcast %112 : vector<4x1x16xf32> to vector<4x8x16xf32>
    %115 = arith.subf %113, %114 : vector<4x8x16xf32>
    %116 = arith.mulf %115, %115 : vector<4x8x16xf32>
    %117 = arith.addf %110, %116 : vector<4x8x16xf32>
    %118 = vector.extract_strided_slice %76 {offsets = [0, 0, 6], sizes = [4, 8, 1], strides = [1, 1, 1]} : vector<4x8x8xf32> to vector<4x8x1xf32>
    %119 = vector.extract_strided_slice %4 {offsets = [0, 6, 0], sizes = [4, 1, 16], strides = [1, 1, 1]} : vector<4x8x16xf32> to vector<4x1x16xf32>
    %120 = vector.broadcast %118 : vector<4x8x1xf32> to vector<4x8x16xf32>
    %121 = vector.broadcast %119 : vector<4x1x16xf32> to vector<4x8x16xf32>
    %122 = arith.subf %120, %121 : vector<4x8x16xf32>
    %123 = arith.mulf %122, %122 : vector<4x8x16xf32>
    %124 = arith.addf %117, %123 : vector<4x8x16xf32>
    %125 = vector.extract_strided_slice %76 {offsets = [0, 0, 7], sizes = [4, 8, 1], strides = [1, 1, 1]} : vector<4x8x8xf32> to vector<4x8x1xf32>
    %126 = vector.extract_strided_slice %4 {offsets = [0, 7, 0], sizes = [4, 1, 16], strides = [1, 1, 1]} : vector<4x8x16xf32> to vector<4x1x16xf32>
    %127 = vector.broadcast %125 : vector<4x8x1xf32> to vector<4x8x16xf32>
    %128 = vector.broadcast %126 : vector<4x1x16xf32> to vector<4x8x16xf32>
    %129 = arith.subf %127, %128 : vector<4x8x16xf32>
    %130 = arith.mulf %129, %129 : vector<4x8x16xf32>
    %131 = arith.addf %124, %130 : vector<4x8x16xf32>
    %cst_21 = arith.constant 9.99999997E-7 : f32
    %cst_22 = arith.constant 1.000000e+06 : f32
    %132 = vector.broadcast %cst_21 : f32 to vector<4x8x16xf32>
    %133 = arith.maximumf %132, %131 : vector<4x8x16xf32>
    %134 = vector.broadcast %cst_22 : f32 to vector<4x8x16xf32>
    %135 = arith.minimumf %134, %133 : vector<4x8x16xf32>
    %136 = math.sqrt %135 : vector<4x8x16xf32>
    %cst_23 = arith.constant -1.000000e-01 : f32
    %137 = vector.broadcast %cst_23 : f32 to vector<4x8x16xf32>
    %138 = arith.mulf %137, %136 : vector<4x8x16xf32>
    %139 = math.exp %138 : vector<4x8x16xf32>
    %c0_24 = arith.constant 0 : index
    %c8_25 = arith.constant 8 : index
    %c0_26 = arith.constant 0 : index
    %140 = vector.load %arg3[%c0_24, %c8_25, %c0_26] : memref<4x16x16xf32, #tpu.memory_space<vmem>>, vector<4x8x16xf32>
    tpu.vector_store %arg3[%c0_24, %c8_25, %c0_26], %139 {strides = array<i32>} : memref<4x16x16xf32, #tpu.memory_space<vmem>>, vector<4x8x16xf32>,
    return
  }
  func.func @transform_0(%arg0: i32) -> (i32, i32, i32) {
    %c0_i32 = arith.constant 0 : i32
    %c0_i32_0 = arith.constant 0 : i32
    %c0_i32_1 = arith.constant 0 : i32
    return %arg0, %c0_i32, %c0_i32_0 : i32, i32, i32
  }
  func.func @transform_1(%arg0: i32) -> (i32, i32, i32) {
    %c0_i32 = arith.constant 0 : i32
    %c0_i32_0 = arith.constant 0 : i32
    %c0_i32_1 = arith.constant 0 : i32
    return %arg0, %c0_i32, %c0_i32_0 : i32, i32, i32
  }
  func.func @transform_2(%arg0: i32) -> (i32, i32, i32) {
    %c0_i32 = arith.constant 0 : i32
    %c0_i32_0 = arith.constant 0 : i32
    %c0_i32_1 = arith.constant 0 : i32
    return %arg0, %c0_i32, %c0_i32_0 : i32, i32, i32
  }
}

</mosaic_0001>

<bundles_post_ra>
// kernel: tpu_custom_call.1
= control target key start
LH: loop header
LB: loop body
LE: loop exit
PB: predicated region body
PF: predicated region fallthrough
CT: control target
= control target key end

     0   :  { %7 = vsyncpa [#allocation3], 0  ;;  %s2036_s0 = inlined_call_operand.vmem [shape: f32[8,16,8], index: 0, kind: input, shape index: {}]   ;;  %s2037_s1 = inlined_call_operand.vmem [shape: f32[8,16,1], index: 1, kind: input, shape index: {}]   ;;  %s2038_s2 = inlined_call_operand.hbm [shape: f32[8,16,16], index: 2, kind: output, shape index: {}]  }
   0x1   :  { %9 = vsyncpa [#allocation3 + $0x1], 0  ;;  %s1418_s9 = smov 0   ;;  %s1420_s10 = smov 0  }
   0x2   :  { %s1422_s11 = smov 0   ;;  %s1424_s12 = smov 0  }
   0x3 LB: > { %s1439_s13 = sadd.s32 4294967295, %s1390_s12   ;;  %s1199_s14 = sadd.s32 4294967294, %s1390_s12   ;;  %s1390_s12 = sphi %s1424_s12, %s2047_s12   ;;  %s1386_s11 = sphi %s1422_s11, %s2046_s11   ;;  %s1382_s10 = sphi %s1420_s10, %s2045_s10   ;;  %s1378_s9 = sphi %s1418_s9, %s2044_s9  }
   0x4   : > { %s1443_s15 = sadd.s32 1, %s1390_s12   ;;  %s74_s16 = sadd.s32 1, %s1386_s11 }
   0x5   : > { %s71_s17 = ssub.s32 %s1390_s12, %s1443_s15  ;;  %p84_p0 = scmp.ne.s32.totalorder %s1386_s11, %s1382_s10 }
   0x6   : > { %p72_p1 = scmp.eq.s32.totalorder %s71_s17, 0  ;;  %p85_p2 = scmp.eq.s32.totalorder %s1439_s13, 1 }
   0x7   : > { %p90_p3 = scmp.ne.s32.totalorder %s1382_s10, %s1378_s9  ;;  %p91_p4 = scmp.eq.s32.totalorder %s1199_s14, 1 }
   0x8   : > { %s1454_s18 = scalar_select %p72_p1, %s1386_s11, %s74_s16  }
   0x9   : > { %p1456_p5 = por %p85_p2, %p84_p0  ;;  %p1460_p6 = por %p91_p4, %p90_p3 }
   0xa   : > { %p1202_p7 = scmp.ge.s32.totalorder %s1390_s12, 1  ;;  %p129_p8 = scmp.lt.s32.totalorder %s1390_s12, 3 }
   0xc   : > { %p130_p9 = pnand %p1202_p7, %p129_p8 }
   0xe   : > { %133 = sbr.rel (%p130_p9) target bundleno = 701 (0x2bd), region = 28 }
  0x13   : > { %s1204_s21 = sshll.u32 %s1439_s13, 2  ;;  %v1392_v0 = vmov 0   ;;  %v1393_v32 = vmov 1   ;;  %v1394_v33 = vmov 2   ;;  %v1395_v34 = vmov 3   ;;  %s155_s29 = sand.u32 1, %s1382_s10  }
  0x14   : > { %1271 = vset.pattern.permute.xlu1 %v1392_v0  ;;  %1270 = vset.pattern.permute.xlu0 %v1392_v0  ;;  %p159_p10 = scmp.lt.s32.totalorder %s1204_s21, 7  ;;  %v1396_v38 = vmov 4   ;;  %v1397_v40 = vmov 5   ;;  %v1398_v46 = vmov 6   ;;  %v1399_v49 = vmov 7   ;;  %s1203_s30 = sshll.u32 %s155_s29, 6 }
  0x15   : > { %v417_v62 = vlaneseq  ;;  %vm797_vm6 = vcmask 130048   ;;  %s1957_s3 = scalar_lea.vmem [#allocation2], %s1203_s30  ;;  %s1219_s4 = sshll.u32 %s1439_s13, 10 }
  0x16   : > { %s2049_s21 = smov (!%p159_p10, %s1204_s21), 7  ;;  %s1125_s5 = sshll.u32 %s1957_s3, 4  ;;  %s1990_s5 = int_to_ptr.vmem [resolvable:$true] %s1125_s5 }
  0x17   : > { %s1216_s22 = sshll.u32 %s2049_s21, 4  ;;  %v1583_v63 = vshrl.u32 %v417_v62, 7  ;;  %s1988_s8 = scalar_lea.hbm %s2038_s2, %s1219_s4 }
  0x18   : > { %s170_s25 = scalar_lea.vmem %s2037_s1, %s1216_s22  ;;  %s1484_s28 = scalar_lea.vmem %s2036_s0, %s1216_s22 }
  0x19   : > { %v183_v1 = vld [vmem:[%s170_s25 + $0x10] sm:$0xff]  ;;  %v181_v2 = vld [vmem:[%s170_s25] sm:$0xff]  ;;  %v184_v3 = vld [vmem:[%s170_s25 + $0x18] sm:$0xff]  ;;  %s1996_s13 = scalar_lea.sflag [#allocation3], %s155_s29  ;;  %s1330_s14 = scalar_lea.vmem %s1990_s5, 1024 }
  0x1a   : > { %201 = vperm.xlu1 %1271, %v183_v1   ;;  %191 = vperm.xlu0 %1270, %v181_v2   ;;  %v1472_v4 = vld [vmem:[%s170_s25 + $0x8] sm:$0xff]  ;;  %v185_v6 = vld [vmem:[%s170_s25 + $0x20] sm:$0xff]  ;;  %v1478_v7 = vld [vmem:[%s170_s25 + $0x38] sm:$0xff]  ;;  %p1331_p11 = scmp.ne.s32.totalorder %s1990_s5, %s1330_s14  ;;  %s1400_s16 = smov [#allocation2]  }
  0x1b   : > { %v1475_v5 = vld [vmem:[%s170_s25 + $0x28] sm:$0xff]  ;;  %v187_v8 = vld [vmem:[%s170_s25 + $0x30] sm:$0xff]  ;;  %v173_v9 = vld [vmem:[%s1484_s28] sm:$0xff]  ;;  %s1334_s17 = sshll.u32 %s1400_s16, 4  ;;  %s1335_s17 = int_to_ptr.vmem [resolvable:$false] %s1334_s17 }
  0x1c   : > { %v177_v15 = vld [vmem:[%s1484_s28 + $0x20] sm:$0xff]  ;;  %v179_v19 = vld [vmem:[%s1484_s28 + $0x30] sm:$0xff]  ;;  %v176_v36 = vld [vmem:[%s1484_s28 + $0x18] sm:$0xff]  ;;  %p1332_p12 = pnand %p1331_p11, %p1456_p5  ;;  %s1336_s21 = scalar_lea.vmem %s1335_s17, 2048 }
  0x1d   : > { %v175_v26 = vld [vmem:[%s1484_s28 + $0x10] sm:$0xff]  ;;  %v174_v52 = vld [vmem:[%s1484_s28 + $0x8] sm:$0xff]  ;;  %v180_v59 = vld [vmem:[%s1484_s28 + $0x38] sm:$0xff]  ;;  %p1337_p0 = scmp.lt.s32.totalorder %s1990_s5, %s1335_s17  ;;  %p1338_p1 = scmp.lt.s32.totalorder %s1336_s21, %s1330_s14 }
  0x1e   : > { %206 = vperm.xlu1 %1271, %v184_v3   ;;  %196 = vperm.xlu0 %1270, %v1472_v4   ;;  %v178_v55 = vld [vmem:[%s1484_s28 + $0x28] sm:$0xff]  ;;  %p1333_p13 = pneg %p1332_p12 }
  0x1f   : > { %p1339_p2 = por %p1338_p1, %p1337_p0 }
  0x21   : > { %p1340_p3 = pnand %p1339_p2, %p1333_p13 }
  0x22   : > { %216 = vperm.xlu1 %1271, %v1475_v5   ;;  %211 = vperm.xlu0 %1270, %v185_v6  }
  0x26   : > { %226 = vperm.xlu1 %1271, %v1478_v7   ;;  %221 = vperm.xlu0 %1270, %v187_v8  }
  0x2a   : > { %375 = vperm.xlu1 %1271, %v181_v2   ;;  %380 = vperm.xlu0 %1270, %v183_v1   ;;  %v1588_v1 = vsub.s32 3, %v1583_v63 }
  0x2e   : > { %385 = vperm.xlu1 %1271, %v185_v6  }
  0x32   : > { %390 = vperm.xlu1 %1271, %v187_v8   ;;  %v1605_v8 = vsub.s32 5, %v1583_v63 }
  0x95   : > { %v202_v10 = vpop.permute.xlu1 %201  ;;  %v192_v11 = vpop.permute.xlu0 %191 }
  0x96   : > { %v1487_v12 = vmul.f32 %v192_v11, %v173_v9  ;;  %v231_v35 = vmul.f32 %v202_v10, %v175_v26 }
  0x99   : > { %v207_v13 = vpop.permute.xlu1 %206  ;;  %v1489_v14 = vpop.permute.xlu0 %196 }
  0x9a   : > { %v232_v37 = vmul.f32 %v207_v13, %v176_v36  ;;  %v230_v53 = vmul.f32 %v1489_v14, %v174_v52 }
  0x9d   : > { %v1492_v16 = vpop.permute.xlu1 %216  ;;  %v212_v17 = vpop.permute.xlu0 %211 }
  0x9e   : > { %v1494_v18 = vmul.f32 %v212_v17, %v177_v15  ;;  %v234_v57 = vmul.f32 %v1492_v16, %v178_v55  ;;  %v1621_v16 = vsub.s32 0, %v1583_v63 }
  0xa1   : > { %v1497_v20 = vpop.permute.xlu1 %226  ;;  %v222_v21 = vpop.permute.xlu0 %221 }
  0xa2   : > { %v1499_v22 = vmul.f32 %v222_v21, %v179_v19  ;;  %v236_v60 = vmul.f32 %v1497_v20, %v180_v59 }
  0xa5   : > { %v376_v23 = vpop.permute.xlu1 %375  ;;  %v381_v25 = vpop.permute.xlu0 %380 }
  0xa6   : > { %v1501_v24 = vmul.f32 %v376_v23, %v173_v9  ;;  %v1505_v28 = vmul.f32 %v381_v25, %v175_v26 }
  0xa8   : > { %399 = vperm.xlu1 %1271, %v1501_v24  }
  0xa9   : > { %v386_v27 = vpop.permute.xlu1 %385 }
  0xaa   : > { %v1507_v29 = vmul.f32 %v386_v27, %v177_v15  ;;  %v1652_v27 = vsub.s32 7, %v1583_v63 }
  0xac   : > { %409 = vperm.xlu0 %1270, %v1507_v29   ;;  %404 = vperm.xlu1 %1271, %v1505_v28  }
  0xad   : > { %v391_v30 = vpop.permute.xlu1 %390 }
  0xae   : > { %v1511_v31 = vmul.f32 %v391_v30, %v179_v19 }
  0xb0   : > { %1272 = vset.pattern.permute.xlu0 %v1393_v32  ;;  %414 = vperm.xlu1 %1271, %v1511_v31  }
  0xb1   : > { %442 = vperm.xlu0 %1272, %v1501_v24  }
  0xb4   : > { %1273 = vset.pattern.permute.xlu1 %v1393_v32 }
  0xb5   : > { %454 = vperm.xlu0 %1272, %v1511_v31   ;;  %446 = vperm.xlu1 %1273, %v1505_v28  }
  0xb9   : > { %1279 = vset.pattern.permute.xlu0 %v1392_v0  ;;  %450 = vperm.xlu1 %1273, %v1507_v29  }
  0xba   : > { %817 = vperm.xlu0 %1279, %v184_v3  }
  0xbd   : > { %1274 = vset.pattern.permute.xlu1 %v1394_v33 }
  0xbe   : > { %486 = vperm.xlu1 %1274, %v1501_v24  }
  0xc2   : > { %494 = vperm.xlu1 %1274, %v1507_v29  }
  0xc6   : > { %498 = vperm.xlu1 %1274, %v1511_v31  }
  0xca   : > { %1275 = vset.pattern.permute.xlu1 %v1395_v34 }
  0xcb   : > { %534 = vperm.xlu1 %1275, %v1505_v28  }
  0xcf   : > { %538 = vperm.xlu1 %1275, %v1507_v29  }
  0xf8   : > { %269 = vxpose.xlu1.b32.start [1/2] (short) (narrow) %v231_v35, 8 }
  0xfc   : > { %270 = vxpose.xlu1.b32.end [2/2] (short) (narrow) %v232_v37, 8  ;;  %v1677_v37 = vsub.s32 6, %v1583_v63 }
 0x11a   : > { %1276 = vset.pattern.permute.xlu1 %v1396_v38 }
 0x11b   : > { %574 = vperm.xlu1 %1276, %v1501_v24  }
 0x11f   : > { %582 = vperm.xlu1 %1276, %v1507_v29  }
 0x123   : > { %586 = vperm.xlu1 %1276, %v1511_v31   ;;  %v1549_v45 = vpop.permute.xlu1 %399 }
 0x127   : > { %v1533_v39 = vpop.permute.xlu0 %409  ;;  %1277 = vset.pattern.permute.xlu1 %v1397_v40  ;;  %v1554_v47 = vpop.permute.xlu1 %404 }
 0x128   : > { %622 = vperm.xlu1 %1277, %v1505_v28  }
 0x12b   : > { %v1557_v48 = vpop.permute.xlu1 %414 }
 0x12c   : > { %v1537_v41 = vpop.permute.xlu0 %442  ;;  %1278 = vset.pattern.permute.xlu1 %v1392_v0 }
 0x12d   : > { %812 = vperm.xlu1 %1278, %v1472_v4  }
 0x130   : > { %v1541_v42 = vpop.permute.xlu0 %454  ;;  %v1561_v50 = vpop.permute.xlu1 %446 }
 0x131   : > { %822 = vperm.xlu1 %1278, %v1475_v5  }
 0x134   : > { %v1565_v51 = vpop.permute.xlu1 %450 }
 0x135   : > { %v818_v43 = vpop.permute.xlu0 %817  ;;  %827 = vperm.xlu1 %1278, %v1478_v7  }
 0x136   : > { %v1545_v44 = vmul.f32 %v818_v43, %v176_v36  ;;  %v1674_v36 = vsub.s32 4, %v1583_v63 }
 0x138   : > { %841 = vperm.xlu0 %1279, %v1545_v44  }
 0x139   : > { %1280 = vset.pattern.permute.xlu1 %v1397_v40  ;;  %v1571_v54 = vpop.permute.xlu1 %486 }
 0x13a   : > { %630 = vperm.xlu1 %1280, %v1511_v31  }
 0x13d   : > { %v1574_v56 = vpop.permute.xlu1 %494 }
 0x13e   : > { %1281 = vset.pattern.permute.xlu1 %v1398_v46 }
 0x13f   : > { %662 = vperm.xlu1 %1281, %v1501_v24  }
 0x141   : > { %v1578_v58 = vpop.permute.xlu1 %498 }
 0x143   : > { %670 = vperm.xlu1 %1281, %v1507_v29  }
 0x146   : > { %v535_v61 = vpop.permute.xlu1 %534 }
 0x147   : > { %674 = vperm.xlu1 %1281, %v1511_v31  }
 0x14b   : > { %1282 = vset.pattern.permute.xlu1 %v1399_v49 }
 0x14c   : > { %710 = vperm.xlu1 %1282, %v1505_v28  }
 0x150   : > { %714 = vperm.xlu1 %1282, %v1507_v29  }
 0x154   : > { %1283 = vset.pattern.permute.xlu1 %v1392_v0  ;;  %v1585_v0 = vpop.permute.xlu1 %538 }
 0x156   : > { %237 = vxpose.xlu0.b32.start [1/2] (short) (narrow) %v1487_v12, 8 }
 0x15a   : > { %238 = vxpose.xlu0.b32.end [2/2] (short) (narrow) %v230_v53, 8 }
 0x15e   : > { %301 = vxpose.xlu0.b32.start [1/2] (short) (narrow) %v1494_v18, 8 }
 0x162   : > { %302 = vxpose.xlu0.b32.end [2/2] (short) (narrow) %v234_v57, 8 }
 0x166   : > { %333 = vxpose.xlu0.b32.start [1/2] (short) (narrow) %v1499_v22, 8 }
 0x16a   : > { %334 = vxpose.xlu0.b32.end [2/2] (short) (narrow) %v236_v60, 8 }
 0x174   : > { %v1590_v2 = vpop.trf.xlu1 }
 0x175   : > { %v1594_v3 = vrot.slane %v1590_v2, %v1588_v1  ;;  %v1609_v9 = vrot.slane %v1590_v2, %v1605_v8  ;;  %v1628_v19 = vrot.slane %v1590_v2, %v1621_v16  ;;  %v1658_v30 = vrot.slane %v1590_v2, %v1652_v27 }
 0x177   : > { %v1597_v4 = vsub.f32 %v535_v61, %v1594_v3  ;;  %2042 = vst [vmem:[#allocation5_spill] sm:$0xff] %v1658_v30 }
 0x193   : > { %1284 = vset.pattern.permute.xlu0 %v1393_v32 }
 0x196   : > { %v575_v5 = vpop.permute.xlu1 %574 }
 0x19a   : > { %v1600_v6 = vpop.permute.xlu1 %582 }
 0x19e   : > { %v1602_v7 = vpop.permute.xlu1 %586 }
 0x1a3   : > { %v623_v10 = vpop.permute.xlu1 %622 }
 0x1a4   : > { %v1612_v11 = vsub.f32 %v623_v10, %v1609_v9 }
 0x1a8   : > { %v813_v12 = vpop.permute.xlu1 %812 }
 0x1a9   : > { %v1614_v13 = vmul.f32 %v813_v12, %v174_v52 }
 0x1ab   : > { %836 = vperm.xlu1 %1283, %v1614_v13   ;;  %863 = vperm.xlu0 %1284, %v1614_v13  }
 0x1ac   : > { %v823_v14 = vpop.permute.xlu1 %822 }
 0x1ad   : > { %v1618_v15 = vmul.f32 %v823_v14, %v178_v55  ;;  %v1746_v14 = vsub.s32 2, %v1583_v63 }
 0x1af   : > { %846 = vperm.xlu1 %1283, %v1618_v15  }
 0x1b0   : > { %v828_v17 = vpop.permute.xlu1 %827 }
 0x1b1   : > { %v1624_v18 = vmul.f32 %v828_v17, %v180_v59 }
 0x1b3   : > { %v842_v20 = vpop.permute.xlu0 %841  ;;  %851 = vperm.xlu1 %1283, %v1624_v18   ;;  %875 = vperm.xlu0 %1284, %v1624_v18  }
 0x1b4   : > { %v1633_v21 = vsub.f32 %v842_v20, %v1628_v19 }
 0x1b5   : > { %v1635_v22 = vpop.permute.xlu1 %630 }
 0x1b7   : > { %1285 = vset.pattern.permute.xlu1 %v1393_v32  ;;  %1286 = vset.pattern.permute.xlu0 %v1394_v33 }
 0x1b8   : > { %867 = vperm.xlu1 %1285, %v1545_v44   ;;  %490 = vperm.xlu0 %1286, %v1505_v28  }
 0x1ba   : > { %v663_v23 = vpop.permute.xlu1 %662 }
 0x1bc   : > { %871 = vperm.xlu1 %1285, %v1618_v15   ;;  %895 = vperm.xlu0 %1286, %v1545_v44  }
 0x1be   : > { %v1643_v25 = vpop.permute.xlu1 %670 }
 0x1c0   : > { %1287 = vset.pattern.permute.xlu1 %v1394_v33  ;;  %1288 = vset.pattern.permute.xlu0 %v1395_v34 }
 0x1c1   : > { %891 = vperm.xlu1 %1287, %v1614_v13   ;;  %530 = vperm.xlu0 %1288, %v1501_v24  }
 0x1c2   : > { %v1649_v26 = vpop.permute.xlu1 %674 }
 0x1c5   : > { %899 = vperm.xlu1 %1287, %v1618_v15   ;;  %542 = vperm.xlu0 %1288, %v1511_v31  }
 0x1c7   : > { %v711_v32 = vpop.permute.xlu1 %710 }
 0x1c8   : > { %v1661_v33 = vsub.f32 %v711_v32, %v1658_v30 }
 0x1c9   : > { %903 = vperm.xlu1 %1287, %v1624_v18   ;;  %919 = vperm.xlu0 %1288, %v1614_v13  }
 0x1cd   : > { %1289 = vset.pattern.permute.xlu1 %v1395_v34  ;;  %931 = vperm.xlu0 %1288, %v1624_v18  }
 0x1ce   : > { %923 = vperm.xlu1 %1289, %v1545_v44  }
 0x1d1   : > { %1290 = vset.pattern.permute.xlu0 %v1396_v38 }
 0x1d2   : > { %927 = vperm.xlu1 %1289, %v1618_v15   ;;  %578 = vperm.xlu0 %1290, %v1505_v28   ;;  %v1671_v35 = vpop.trf.xlu0 }
 0x1d3   : > { %v1681_v34 = vrot.slane %v1671_v35, %v1674_v36  ;;  %v1685_v43 = vrot.slane %v1671_v35, %v1677_v37 }
 0x1d5   : > { %v1690_v52 = vsub.f32 %v575_v5, %v1681_v34  ;;  %v1693_v53 = vsub.f32 %v663_v23, %v1685_v43  ;;  %v434_v5 = vsub.f32 %v1554_v47, %v1628_v19  ;;  %v508_v23 = vrot.slane %v1590_v2, %v1746_v14 }
 0x1d6   : > { %1291 = vset.pattern.permute.xlu1 %v1396_v38  ;;  %951 = vperm.xlu0 %1290, %v1545_v44  }
 0x1d7   : > { %947 = vperm.xlu1 %1291, %v1614_v13  }
 0x1da   : > { %1292 = vset.pattern.permute.xlu0 %v1397_v40 }
 0x1db   : > { %955 = vperm.xlu1 %1291, %v1618_v15   ;;  %618 = vperm.xlu0 %1292, %v1501_v24  }
 0x1df   : > { %959 = vperm.xlu1 %1291, %v1624_v18   ;;  %626 = vperm.xlu0 %1292, %v1507_v29   ;;  %v1723_v29 = vpop.permute.xlu1 %714 }
 0x1e3   : > { %1293 = vset.pattern.permute.xlu1 %v1397_v40  ;;  %975 = vperm.xlu0 %1292, %v1614_v13  }
 0x1e4   : > { %979 = vperm.xlu1 %1293, %v1545_v44  }
 0x1e7   : > { %987 = vperm.xlu0 %1292, %v1624_v18  }
 0x1e8   : > { %983 = vperm.xlu1 %1293, %v1618_v15  }
 0x1eb   : > { %1294 = vset.pattern.permute.xlu0 %v1398_v46 }
 0x1ec   : > { %1295 = vset.pattern.permute.xlu1 %v1398_v46  ;;  %666 = vperm.xlu0 %1294, %v1505_v28   ;;  %v1721_v28 = vpop.trf.xlu0 }
 0x1ed   : > { %1003 = vperm.xlu1 %1295, %v1614_v13  }
 0x1f0   : > { %1007 = vperm.xlu0 %1294, %v1545_v44   ;;  %v1725_v38 = vpop.trf.xlu0 }
 0x1f1   : > { %1011 = vperm.xlu1 %1295, %v1618_v15   ;;  %v1754_v47 = vrot.slane %v1725_v38, %v1621_v16 }
 0x1f4   : > { %1296 = vset.pattern.permute.xlu0 %v1399_v49 }
 0x1f5   : > { %1015 = vperm.xlu1 %1295, %v1624_v18   ;;  %706 = vperm.xlu0 %1296, %v1501_v24   ;;  %v1728_v24 = vsub.s32 1, %v1583_v63 }
 0x1f7   : > { %v460_v40 = vrot.slane %v1671_v35, %v1728_v24  ;;  %v464_v60 = vrot.slane %v1590_v2, %v1728_v24 }
 0x1f9   : > { %1297 = vset.pattern.permute.xlu1 %v1399_v49  ;;  %718 = vperm.xlu0 %1296, %v1511_v31   ;;  %v420_v31 = vrot.slane %v1671_v35, %v1621_v16  ;;  %v474_v10 = vsub.f32 %v1561_v50, %v464_v60  ;;  %v473_v20 = vsub.f32 %v1537_v41, %v460_v40 }
 0x1fa   : > { %1035 = vperm.xlu1 %1297, %v1545_v44   ;;  %v1758_v50 = vrot.slane %v1725_v38, %v1728_v24  ;;  %v859_v41 = vmul.f32 %v1633_v21, %v1633_v21 }
 0x1fb   : > { %v478_v17 = vmul.f32 %v474_v10, %v474_v10  ;;  %v566_v10 = vmul.f32 %v1597_v4, %v1597_v4 }
 0x1fd   : > { %1031 = vperm.xlu0 %1296, %v1614_v13  }
 0x1fe   : > { %1039 = vperm.xlu1 %1297, %v1618_v15   ;;  %v438_v15 = vmul.f32 %v434_v5, %v434_v5 }
 0x201   : > { %1043 = vperm.xlu0 %1296, %v1624_v18   ;;  %v433_v18 = vsub.f32 %v1549_v45, %v420_v31  ;;  %v504_v45 = vrot.slane %v1671_v35, %v1746_v14 }
 0x226   : > { %v837_v44 = vpop.permute.xlu1 %836  ;;  %v864_v46 = vpop.permute.xlu0 %863 }
 0x227   : > { %v854_v49 = vsub.f32 %v837_v44, %v420_v31  ;;  %v878_v55 = vsub.f32 %v864_v46, %v460_v40  ;;  %v482_v31 = vadd.f32 %v478_v17, %v438_v15  ;;  %v437_v40 = vmul.f32 %v433_v18, %v433_v18 }
 0x228   : > { %v477_v46 = vmul.f32 %v473_v20, %v473_v20  ;;  %v517_v15 = vsub.f32 %v1571_v54, %v504_v45  ;;  %v1775_v17 = vrot.slane %v1725_v38, %v1746_v14  ;;  %v1783_v54 = vrot.slane %v1725_v38, %v1674_v36 }
 0x229   : > { %v858_v57 = vmul.f32 %v854_v49, %v854_v49  ;;  %v882_v59 = vmul.f32 %v878_v55, %v878_v55 }
 0x22a   : > { %v1736_v61 = vpop.permute.xlu1 %846 }
 0x22b   : > { %v886_v62 = vadd.f32 %v882_v59, %v858_v57  ;;  %v436_v57 = vsub.f32 %v1557_v48, %v1754_v47  ;;  %v476_v59 = vsub.f32 %v1541_v42, %v1758_v50  ;;  %v481_v48 = vadd.f32 %v477_v46, %v437_v40 }
 0x22c   : > { %v520_v40 = vsub.f32 %v1578_v58, %v1775_v17  ;;  %v608_v58 = vsub.f32 %v1602_v7, %v1783_v54  ;;  %v1816_v7 = vrot.slane %v1721_v28, %v1728_v24 }
 0x22d   : > { %v440_v42 = vmul.f32 %v436_v57, %v436_v57 }
 0x22e   : > { %v1741_v12 = vpop.permute.xlu1 %851  ;;  %v1743_v13 = vpop.permute.xlu0 %875  ;;  %v475_v24 = vsub.f32 %v1565_v51, %v1816_v7 }
 0x233   : > { %v868_v19 = vpop.permute.xlu1 %867  ;;  %v491_v63 = vpop.permute.xlu0 %490 }
 0x234   : > { %v879_v32 = vsub.f32 %v868_v19, %v464_v60  ;;  %v518_v44 = vsub.f32 %v491_v63, %v508_v23 }
 0x236   : > { %v883_v49 = vmul.f32 %v879_v32, %v879_v32  ;;  %v522_v55 = vmul.f32 %v518_v44, %v518_v44  ;;  %v480_v32 = vmul.f32 %v476_v59, %v476_v59  ;;  %v548_v44 = vrot.slane %v1671_v35, %v1588_v1 }
 0x237   : > { %v1768_v5 = vpop.permute.xlu1 %871  ;;  %v896_v60 = vpop.permute.xlu0 %895 }
 0x238   : > { %v887_v19 = vadd.f32 %v883_v49, %v859_v41  ;;  %v526_v63 = vadd.f32 %v522_v55, %v482_v31  ;;  %v907_v21 = vsub.f32 %v896_v60, %v508_v23  ;;  %v521_v41 = vmul.f32 %v517_v15, %v517_v15 }
 0x239   : > { %v1789_v55 = vrot.slane %v1725_v38, %v1588_v1  ;;  %v484_v57 = vadd.f32 %v480_v32, %v440_v42  ;;  %v524_v42 = vmul.f32 %v520_v40, %v520_v40 }
 0x23a   : > { %v911_v18 = vmul.f32 %v907_v21, %v907_v21  ;;  %v1777_v20 = vadd.f32 %v566_v10, %v526_v63  ;;  %v525_v46 = vadd.f32 %v521_v41, %v481_v48  ;;  %v1793_v10 = vrot.slane %v1725_v38, %v1605_v8 }
 0x23b   : > { %v1803_v21 = vrot.slane %v1725_v38, %v1677_v37 }
 0x23c   : > { %v915_v30 = vadd.f32 %v911_v18, %v887_v19  ;;  %v892_v4 = vpop.permute.xlu1 %891  ;;  %v531_v31 = vpop.permute.xlu0 %530 }
 0x23d   : > { %v906_v23 = vsub.f32 %v892_v4, %v504_v45  ;;  %v561_v49 = vsub.f32 %v531_v31, %v548_v44  ;;  %v609_v45 = vmul.f32 %v1690_v52, %v1690_v52  ;;  %v528_v4 = vadd.f32 %v524_v42, %v484_v57 }
 0x23e   : > { %v652_v31 = vsub.f32 %v1635_v22, %v1793_v10  ;;  %v1812_v52 = vrot.slane %v1721_v28, %v1621_v16  ;;  %v696_v57 = vsub.f32 %v1649_v26, %v1803_v21  ;;  %v1831_v26 = vrot.slane %v1721_v28, %v1746_v14 }
 0x23f   : > { %v910_v59 = vmul.f32 %v906_v23, %v906_v23  ;;  %v565_v60 = vmul.f32 %v561_v49, %v561_v49  ;;  %v1843_v14 = vrot.slane %v1721_v28, %v1588_v1  ;;  %v1853_v1 = vrot.slane %v1721_v28, %v1674_v36 }
 0x240   : > { %v1795_v19 = vpop.permute.xlu1 %899  ;;  %v543_v63 = vpop.permute.xlu0 %542  ;;  %v656_v22 = vmul.f32 %v652_v31, %v652_v31  ;;  %v435_v16 = vsub.f32 %v1533_v39, %v1812_v52  ;;  %v596_v39 = vrot.slane %v1590_v2, %v1674_v36  ;;  %v479_v31 = vmul.f32 %v475_v24, %v475_v24 }
 0x241   : > { %v914_v15 = vadd.f32 %v910_v59, %v886_v62  ;;  %v569_v18 = vadd.f32 %v565_v60, %v525_v46  ;;  %v564_v48 = vsub.f32 %v543_v63, %v1789_v55  ;;  %v612_v46 = vmul.f32 %v608_v58, %v608_v58 }
 0x242   : > { %v607_v36 = vsub.f32 %v1600_v6, %v1853_v1 }
 0x243   : > { %v568_v32 = vmul.f32 %v564_v48, %v564_v48  ;;  %v1806_v41 = vadd.f32 %v609_v45, %v569_v18  ;;  %v700_v48 = vmul.f32 %v696_v57, %v696_v57 }
 0x244   : > { %v1818_v62 = vpop.permute.xlu1 %903  ;;  %v920_v23 = vpop.permute.xlu0 %919 }
 0x245   : > { %v572_v49 = vadd.f32 %v568_v32, %v528_v4  ;;  %v934_v40 = vsub.f32 %v920_v23, %v548_v44  ;;  %v439_v4 = vmul.f32 %v435_v16, %v435_v16 }
 0x247   : > { %v938_v59 = vmul.f32 %v934_v40, %v934_v40  ;;  %v616_v60 = vadd.f32 %v612_v46, %v572_v49  ;;  %v483_v46 = vadd.f32 %v479_v31, %v439_v4 }
 0x248   : > { %v1824_v63 = vpop.permute.xlu0 %931 }
 0x249   : > { %v942_v45 = vadd.f32 %v938_v59, %v914_v15  ;;  %v924_v18 = vpop.permute.xlu1 %923  ;;  %v660_v42 = vadd.f32 %v656_v22, %v616_v60  ;;  %v654_v59 = vmul.f32 %v1612_v11, %v1612_v11  ;;  %v636_v11 = vrot.slane %v1671_v35, %v1605_v8 }
 0x24a   : > { %v935_v44 = vsub.f32 %v924_v18, %v1594_v3  ;;  %v519_v3 = vsub.f32 %v1574_v56, %v1831_v26 }
 0x24b   : > { %v1833_v58 = vadd.f32 %v700_v48, %v660_v42 }
 0x24c   : > { %v939_v32 = vmul.f32 %v935_v44, %v935_v44  ;;  %v523_v24 = vmul.f32 %v519_v3, %v519_v3  ;;  %v1869_v3 = vrot.slane %v1721_v28, %v1605_v8 }
 0x24d   : > { %v1837_v23 = vpop.permute.xlu1 %927  ;;  %v579_v51 = vpop.permute.xlu0 %578 }
 0x24e   : > { %v943_v15 = vadd.f32 %v939_v32, %v915_v30  ;;  %v606_v49 = vsub.f32 %v579_v51, %v596_v39  ;;  %v563_v30 = vsub.f32 %v1585_v0, %v1843_v14  ;;  %v527_v42 = vadd.f32 %v523_v24, %v483_v46 }
 0x24f   : > { %v1863_v0 = vrot.slane %v1721_v28, %v1677_v37 }
 0x250   : > { %v610_v40 = vmul.f32 %v606_v49, %v606_v49 }
 0x251   : > { %v952_v57 = vpop.permute.xlu0 %951 }
 0x252   : > { %v614_v60 = vadd.f32 %v610_v40, %v1777_v20  ;;  %v963_v22 = vsub.f32 %v952_v57, %v596_v39  ;;  %v948_v16 = vpop.permute.xlu1 %947  ;;  %v611_v57 = vmul.f32 %v607_v36, %v607_v36 }
 0x253   : > { %v962_v56 = vsub.f32 %v948_v16, %v1681_v34  ;;  %v567_v34 = vmul.f32 %v563_v30, %v563_v30 }
 0x254   : > { %v967_v18 = vmul.f32 %v963_v22, %v963_v22  ;;  %v1855_v48 = vadd.f32 %v654_v59, %v614_v60  ;;  %v695_v60 = vsub.f32 %v1643_v25, %v1863_v0 }
 0x255   : > { %v966_v44 = vmul.f32 %v962_v56, %v962_v56  ;;  %v571_v49 = vadd.f32 %v567_v34, %v527_v42 }
 0x256   : > { %v971_v20 = vadd.f32 %v967_v18, %v943_v15  ;;  %v1859_v32 = vpop.permute.xlu1 %955  ;;  %v619_v39 = vpop.permute.xlu0 %618  ;;  %v1873_v15 = vrot.slane %v1721_v28, %v1652_v27 }
 0x257   : > { %v970_v4 = vadd.f32 %v966_v44, %v942_v45  ;;  %v649_v31 = vsub.f32 %v619_v39, %v636_v11  ;;  %v697_v45 = vmul.f32 %v1693_v53, %v1693_v53  ;;  %v615_v8 = vadd.f32 %v611_v57, %v571_v49 }
 0x258   : > { %v739_v28 = vsub.f32 %v1723_v29, %v1873_v15  ;;  %v699_v53 = vmul.f32 %v695_v60, %v695_v60  ;;  %v684_v29 = vrot.slane %v1590_v2, %v1677_v37  ;;  %v908_v2 = vsub.f32 %v1795_v19, %v1831_v26 }
 0x259   : > { %v653_v51 = vmul.f32 %v649_v31, %v649_v31 }
 0x25a   : > { %v1875_v40 = vpop.permute.xlu1 %959  ;;  %v627_v46 = vpop.permute.xlu0 %626  ;;  %v743_v39 = vmul.f32 %v739_v28, %v739_v28 }
 0x25b   : > { %v657_v6 = vadd.f32 %v653_v51, %v1806_v41  ;;  %v651_v59 = vsub.f32 %v627_v46, %v1869_v3 }
 0x25d   : > { %v655_v22 = vmul.f32 %v651_v59, %v651_v59  ;;  %v1883_v16 = vadd.f32 %v697_v45, %v657_v6  ;;  %v881_v6 = vsub.f32 %v1743_v13, %v1758_v50 }
 0x25e   : > { %v976_v24 = vpop.permute.xlu0 %975 }
 0x25f   : > { %v659_v30 = vadd.f32 %v655_v22, %v615_v8  ;;  %v990_v56 = vsub.f32 %v976_v24, %v636_v11  ;;  %v980_v18 = vpop.permute.xlu1 %979  ;;  %v857_v11 = vsub.f32 %v1741_v12, %v1754_v47  ;;  %v742_v12 = vmul.f32 %v1661_v33, %v1661_v33 }
 0x260   : > { %v991_v42 = vsub.f32 %v980_v18, %v1609_v9  ;;  %v880_v9 = vsub.f32 %v1768_v5, %v1816_v7  ;;  %v909_v47 = vsub.f32 %v1818_v62, %v1775_v17  ;;  %v936_v7 = vsub.f32 %v1837_v23, %v1843_v14 }
 0x261   : > { %v994_v41 = vmul.f32 %v990_v56, %v990_v56  ;;  %v703_v44 = vadd.f32 %v699_v53, %v659_v30  ;;  %v861_v13 = vmul.f32 %v857_v11, %v857_v11  ;;  %v885_v60 = vmul.f32 %v881_v6, %v881_v6 }
 0x262   : > { %v995_v34 = vmul.f32 %v991_v42, %v991_v42  ;;  %v1888_v36 = vpop.permute.xlu0 %987  ;;  %v884_v50 = vmul.f32 %v880_v9, %v880_v9  ;;  %v912_v22 = vmul.f32 %v908_v2, %v908_v2  ;;  %v964_v17 = vsub.f32 %v1859_v32, %v1853_v1 }
 0x263   : > { %v998_v25 = vadd.f32 %v994_v41, %v970_v4  ;;  %v984_v31 = vpop.permute.xlu1 %983  ;;  %v747_v51 = vadd.f32 %v743_v39, %v703_v44  ;;  %v913_v28 = vmul.f32 %v909_v47, %v909_v47  ;;  %v940_v30 = vmul.f32 %v936_v7, %v936_v7 }
 0x264   : > { %v999_v49 = vadd.f32 %v995_v34, %v971_v20  ;;  %v856_v20 = vsub.f32 %v1736_v61, %v1812_v52  ;;  %v724_v56 = vrot.slane %v1671_v35, %v1652_v27  ;;  %v968_v44 = vmul.f32 %v964_v17, %v964_v17 }
 0x265   : > { %v751_v46 = vmax.f32 %v747_v51, 1e-06  ;;  %v965_v1 = vsub.f32 %v1875_v40, %v1783_v54  ;;  %v992_v34 = vsub.f32 %v984_v31, %v1869_v3  ;;  %v736_v35 = vrot.slane %v1725_v38, %v1652_v27 }
 0x266   : > { %v860_v33 = vmul.f32 %v856_v20, %v856_v20  ;;  %v993_v31 = vsub.f32 %v1888_v36, %v1793_v10 }
 0x267   : > { %v667_v45 = vpop.permute.xlu0 %666  ;;  %v1896_v57 = vmin.f32 %v751_v46, 1000000.0 }
 0x268   : > { %v694_v4 = vsub.f32 %v667_v45, %v684_v29  ;;  %v1004_v59 = vpop.permute.xlu1 %1003  ;;  %v888_v14 = vadd.f32 %v884_v50, %v860_v33  ;;  %v969_v45 = vmul.f32 %v965_v1, %v965_v1 }
 0x269   : > { %v1018_v37 = vsub.f32 %v1004_v59, %v1685_v43  ;;  %1298 = vrsqrt.f32 %v1896_v57  ;;  %v937_v43 = vsub.f32 %v1824_v63, %v1789_v55  ;;  %v889_v55 = vadd.f32 %v885_v60, %v861_v13  ;;  %v2043_v59 = vld [vmem:[#allocation5_spill] sm:$0xff] }
 0x26a   : > { %v698_v5 = vmul.f32 %v694_v4, %v694_v4  ;;  %v916_v41 = vadd.f32 %v912_v22, %v888_v14  ;;  %v996_v4 = vmul.f32 %v992_v34, %v992_v34  ;;  %vm773_vm0 = vcmp.eq.f32.partialorder %v1896_v57, inf }
 0x26b   : > { %v1022_v61 = vmul.f32 %v1018_v37, %v1018_v37  ;;  %v1008_v52 = vpop.permute.xlu0 %1007  ;;  %v941_v63 = vmul.f32 %v937_v43, %v937_v43  ;;  %v917_v39 = vadd.f32 %v913_v28, %v889_v55  ;;  %vm775_vm1 = vcmp.eq.f32.partialorder %v1896_v57, 0.0 }
 0x26c   : > { %v702_v19 = vadd.f32 %v698_v5, %v1855_v48  ;;  %v1019_v26 = vsub.f32 %v1008_v52, %v684_v29  ;;  %v1012_v8 = vpop.permute.xlu1 %1011  ;;  %v944_v51 = vadd.f32 %v940_v30, %v916_v41  ;;  %v776_v47 = vand.u32 2147483648, %v1896_v57 }
 0x26d   : > { %v1917_v62 = vadd.f32 %v1022_v61, %v998_v25  ;;  %v945_v29 = vadd.f32 %v941_v63, %v917_v39  ;;  %v997_v43 = vmul.f32 %v993_v31, %v993_v31 }
 0x26e   : > { %v746_v24 = vadd.f32 %v742_v12, %v702_v19  ;;  %v1023_v23 = vmul.f32 %v1019_v26, %v1019_v26  ;;  %v972_v9 = vadd.f32 %v968_v44, %v944_v51 }
 0x26f   : > { %v973_v60 = vadd.f32 %v969_v45, %v945_v29 }
 0x270   : > { %v750_v48 = vmax.f32 %v746_v24, 1e-06  ;;  %v1027_v18 = vadd.f32 %v1023_v23, %v999_v49  ;;  %v1016_v53 = vpop.permute.xlu1 %1015  ;;  %v707_v42 = vpop.permute.xlu0 %706  ;;  %v1020_v49 = vsub.f32 %v1012_v8, %v1863_v0  ;;  %v1000_v19 = vadd.f32 %v996_v4, %v972_v9 }
 0x271   : > { %v737_v32 = vsub.f32 %v707_v42, %v724_v56 }
 0x272   : > { %v1924_v25 = vmin.f32 %v750_v48, 1000000.0  ;;  %v1024_v2 = vmul.f32 %v1020_v49, %v1020_v49 }
 0x273   : > { %v741_v46 = vmul.f32 %v737_v32, %v737_v32 }
 0x274   : > { %1300 = vrsqrt.f32 %v1924_v25  ;;  %v719_v11 = vpop.permute.xlu0 %718  ;;  %v1028_v17 = vadd.f32 %v1024_v2, %v1000_v19  ;;  %vm766_vm2 = vcmp.eq.f32.partialorder %v1924_v25, inf  ;;  %v769_v41 = vand.u32 2147483648, %v1924_v25 }
 0x275   : > { %v745_v54 = vadd.f32 %v741_v46, %v1883_v16  ;;  %v740_v40 = vsub.f32 %v719_v11, %v736_v35  ;;  %v1036_v6 = vpop.permute.xlu1 %1035  ;;  %v1021_v16 = vsub.f32 %v1016_v53, %v1803_v21  ;;  %vm768_vm3 = vcmp.eq.f32.partialorder %v1924_v25, 0.0 }
 0x276   : > { %v1299_v3 = vpop.eup %1298  ;;  %v1047_v20 = vsub.f32 %v1036_v6, %v2043_v59 }
 0x277   : > { %v749_v27 = vmax.f32 %v745_v54, 1e-06  ;;  %v744_v38 = vmul.f32 %v740_v40, %v740_v40  ;;  %v772_v0 = vmul.f32 %v1299_v3, %v1896_v57  ;;  %v1025_v28 = vmul.f32 %v1021_v16, %v1021_v16 }
 0x278   : > { %v1051_v37 = vmul.f32 %v1047_v20, %v1047_v20  ;;  %v1032_v12 = vpop.permute.xlu0 %1031 }
 0x279   : > { %v753_v5 = vmin.f32 %v749_v27, 1000000.0  ;;  %v748_v10 = vadd.f32 %v744_v38, %v1833_v58  ;;  %v1046_v36 = vsub.f32 %v1032_v12, %v724_v56  ;;  %v1040_v13 = vpop.permute.xlu1 %1039  ;;  %v774_v50 = vsel %vm773_vm0, %v1896_v57, %v772_v0 }
 0x27a   : > { %v1055_v7 = vadd.f32 %v1051_v37, %v1027_v18  ;;  %v777_v61 = vsel %vm775_vm1, %v776_v47, %v774_v50  ;;  %v1048_v52 = vsub.f32 %v1040_v13, %v1873_v15  ;;  %v1001_v56 = vadd.f32 %v997_v43, %v973_v60 }
 0x27b   : > { %1302 = vrsqrt.f32 %v753_v5  ;;  %v752_v21 = vmax.f32 %v748_v10, 1e-06  ;;  %v1050_v8 = vmul.f32 %v1046_v36, %v1046_v36  ;;  %v787_v33 = vmul.f32 -0.1, %v777_v61 }
 0x27c   : > { %v1059_v26 = vmax.f32 %v1055_v7, 1e-06  ;;  %v1044_v22 = vpop.permute.xlu0 %1043  ;;  %v1052_v58 = vmul.f32 %v1048_v52, %v1048_v52  ;;  %v1029_v48 = vadd.f32 %v1025_v28, %v1001_v56  ;;  %vm759_vm4 = vcmp.eq.f32.partialorder %v753_v5, inf }
 0x27d   : > { %v1049_v24 = vsub.f32 %v1044_v22, %v736_v35  ;;  %v756_v23 = vmin.f32 %v752_v21, 1000000.0  ;;  %v1054_v57 = vadd.f32 %v1050_v8, %v1917_v62  ;;  %v793_v30 = vmul.f32 1.442695, %v787_v33 }
 0x27e   : > { %v1063_v14 = vmin.f32 %v1059_v26, 1000000.0  ;;  %v1056_v15 = vadd.f32 %v1052_v58, %v1028_v17  ;;  %v762_v11 = vand.u32 2147483648, %v753_v5  ;;  %vm761_vm5 = vcmp.eq.f32.partialorder %v753_v5, 0.0 }
 0x27f   : > { %v1053_v55 = vmul.f32 %v1049_v24, %v1049_v24  ;;  %1304 = vrsqrt.f32 %v756_v23  ;;  %v1058_v53 = vmax.f32 %v1054_v57, 1e-06  ;;  %vm780_vm7 = vcmp.eq.f32.partialorder %v756_v23, inf }
 0x280   : > { %1306 = vrsqrt.f32 %v1063_v14  ;;  %v1060_v42 = vmax.f32 %v1056_v15, 1e-06  ;;  %v783_v4 = vand.u32 2147483648, %v756_v23  ;;  %vm782_vm8 = vcmp.eq.f32.partialorder %v756_v23, 0.0 }
 0x281   : > { %v1301_v63 = vpop.eup %1300  ;;  %1308 = vpow2.f32 %v793_v30  ;;  %v1057_v44 = vadd.f32 %v1053_v55, %v1029_v48  ;;  %v1062_v1 = vmin.f32 %v1058_v53, 1000000.0  ;;  %vm1075_vm9 = vcmp.eq.f32.partialorder %v1063_v14, inf }
 0x282   : > { %v765_v18 = vmul.f32 %v1301_v63, %v1924_v25  ;;  %v1948_v32 = vmin.f32 %v1060_v42, 1000000.0  ;;  %v1078_v27 = vand.u32 2147483648, %v1063_v14  ;;  %vm1077_vm10 = vcmp.eq.f32.partialorder %v1063_v14, 0.0 }
 0x283   : > { %v1061_v34 = vmax.f32 %v1057_v44, 1e-06  ;;  %1310 = vrsqrt.f32 %v1062_v1  ;;  %vm1068_vm11 = vcmp.eq.f32.partialorder %v1062_v1, inf  ;;  %vm1070_vm12 = vcmp.eq.f32.partialorder %v1062_v1, 0.0 }
 0x284   : > { %v767_v62 = vsel %vm766_vm2, %v1924_v25, %v765_v18  ;;  %1312 = vrsqrt.f32 %v1948_v32  ;;  %v1071_v13 = vand.u32 2147483648, %v1062_v1  ;;  %vm1082_vm13 = vcmp.eq.f32.partialorder %v1948_v32, inf }
 0x285   : > { %v770_v39 = vsel %vm768_vm3, %v769_v41, %v767_v62  ;;  %v1952_v29 = vmin.f32 %v1061_v34, 1000000.0  ;;  %v1085_v61 = vand.u32 2147483648, %v1948_v32  ;;  %vm1084_vm14 = vcmp.eq.f32.partialorder %v1948_v32, 0.0 }
 0x286   : > { %v786_v51 = vmul.f32 -0.1, %v770_v39 }
 0x287   : > { %vm1089_vm15 = vcmp.eq.f32.partialorder %v1952_v29, inf  ;;  %v1092_v17 = vand.u32 2147483648, %v1952_v29  ;;  %vm1091_vm0 = vcmp.eq.f32.partialorder %v1952_v29, 0.0 }
 0x288   : > { %v1303_v46 = vpop.eup %1302  ;;  %v791_v35 = vmul.f32 1.442695, %v786_v51 }
 0x289   : > { %v758_v49 = vmul.f32 %v1303_v46, %v753_v5 }
 0x28a   : > { %1314 = vpow2.f32 %v791_v35 }
 0x28b   : > { %v760_v25 = vsel %vm759_vm4, %v753_v5, %v758_v49  ;;  %1316 = vrsqrt.f32 %v1952_v29 }
 0x28c   : > { %v763_v9 = vsel %vm761_vm5, %v762_v11, %v760_v25  ;;  %v1305_v45 = vpop.eup %1304 }
 0x28d   : > { %v785_v54 = vmul.f32 -0.1, %v763_v9  ;;  %v1307_v40 = vpop.eup %1306  ;;  %v779_v6 = vmul.f32 %v1305_v45, %v756_v23 }
 0x28e   : > { %v1309_v3 = vpop.eup %1308  ;;  %v1074_v59 = vmul.f32 %v1307_v40, %v1063_v14 }
 0x28f   : > { %v789_v31 = vmul.f32 1.442695, %v785_v54  ;;  %v781_v20 = vsel %vm780_vm7, %v756_v23, %v779_v6  ;;  %800 = vst.msk [vmem:[%s1957_s3 + $0x20] sm:$0xff] %vm797_vm6, %v1309_v3 }
 0x290   : > { %v784_v38 = vsel %vm782_vm8, %v783_v4, %v781_v20  ;;  %v1076_v0 = vsel %vm1075_vm9, %v1063_v14, %v1074_v59  ;;  %v1311_v37 = vpop.eup %1310 }
 0x291   : > { %1318 = vpow2.f32 %v789_v31  ;;  %v788_v2 = vmul.f32 -0.1, %v784_v38  ;;  %v1079_v16 = vsel %vm1077_vm10, %v1078_v27, %v1076_v0  ;;  %v1313_v47 = vpop.eup %1312  ;;  %v1067_v10 = vmul.f32 %v1311_v37, %v1062_v1 }
 0x292   : > { %v1095_v12 = vmul.f32 -0.1, %v1079_v16  ;;  %v1081_v50 = vmul.f32 %v1313_v47, %v1948_v32 }
 0x293   : > { %v795_v5 = vmul.f32 1.442695, %v788_v2  ;;  %v1069_v7 = vsel %vm1068_vm11, %v1062_v1, %v1067_v10 }
 0x294   : > { %v1100_v36 = vmul.f32 1.442695, %v1095_v12  ;;  %v1072_v60 = vsel %vm1070_vm12, %v1071_v13, %v1069_v7  ;;  %v1083_v43 = vsel %vm1082_vm13, %v1948_v32, %v1081_v50 }
 0x295   : > { %1320 = vpow2.f32 %v795_v5  ;;  %v1094_v21 = vmul.f32 -0.1, %v1072_v60  ;;  %v1086_v26 = vsel %vm1084_vm14, %v1085_v61, %v1083_v43 }
 0x296   : > { %1322 = vpow2.f32 %v1100_v36  ;;  %v1096_v8 = vmul.f32 -0.1, %v1086_v26 }
 0x297   : > { %v1315_v52 = vpop.eup %1314  ;;  %v1098_v22 = vmul.f32 1.442695, %v1094_v21 }
 0x298   : > { %v1317_v19 = vpop.eup %1316  ;;  %799 = vst.msk [vmem:[%s1957_s3 + $0x10] sm:$0xff] %vm797_vm6, %v1315_v52  ;;  %v1102_v28 = vmul.f32 1.442695, %v1096_v8 }
 0x299   : > { %v1088_v33 = vmul.f32 %v1317_v19, %v1952_v29  ;;  %1324 = vpow2.f32 %v1098_v22 }
 0x29a   : > { %1326 = vpow2.f32 %v1102_v28 }
 0x29b   : > { %v1090_v58 = vsel %vm1089_vm15, %v1952_v29, %v1088_v33 }
 0x29c   : > { %v1093_v24 = vsel %vm1091_vm0, %v1092_v17, %v1090_v58 }
 0x29d   : > { %v1097_v23 = vmul.f32 -0.1, %v1093_v24 }
 0x29e   : > { %v1319_v14 = vpop.eup %1318 }
 0x29f   : > { %v1104_v57 = vmul.f32 1.442695, %v1097_v23  ;;  %798 = vst.msk [vmem:[%s1957_s3] sm:$0xff] %vm797_vm6, %v1319_v14 }
 0x2a1   : > { %1328 = vpow2.f32 %v1104_v57 }
 0x2a2   : > { %v1321_v30 = vpop.eup %1320 }
 0x2a3   : > { %v1323_v56 = vpop.eup %1322  ;;  %801 = vst.msk [vmem:[%s1957_s3 + $0x30] sm:$0xff] %vm797_vm6, %v1321_v30 }
 0x2a4   : > { %1107 = vst.msk [vmem:[%s1957_s3 + $0x18] sm:$0xff] %vm797_vm6, %v1323_v56 }
 0x2a6   : > { %v1325_v15 = vpop.eup %1324 }
 0x2a7   : > { %v1327_v55 = vpop.eup %1326  ;;  %1106 = vst.msk [vmem:[%s1957_s3 + $0x8] sm:$0xff] %vm797_vm6, %v1325_v15 }
 0x2a8   : > { %1108 = vst.msk [vmem:[%s1957_s3 + $0x28] sm:$0xff] %vm797_vm6, %v1327_v55 }
 0x2ae   : > { %v1329_v63 = vpop.eup %1328 }
 0x2af   : > { %1109 = vst.msk [vmem:[%s1957_s3 + $0x38] sm:$0xff] %vm797_vm6, %v1329_v63 }
 0x2b0   : > { %1343 = shalt.err (!%p1340_p3)
}
 0x2b1   : > { %s1344_s22 = scalar_lea.hbm %s1988_s8, 1024  ;;  %s1348_s25 = scalar_lea.hbm %s2038_s2, 2048 }
 0x2b2   : > { %p1345_p4 = scmp.ne.s32.totalorder %s1988_s8, %s1344_s22  ;;  %p1349_p9 = scmp.lt.s32.totalorder %s1988_s8, %s2038_s2 }
 0x2b3   : > { %p1350_p10 = scmp.lt.s32.totalorder %s1348_s25, %s1344_s22 }
 0x2b4   : > { %p1346_p7 = pnand %p1345_p4, %p1456_p5 }
 0x2b5   : > { %p1351_p11 = por %p1350_p10, %p1349_p9 }
 0x2b6   : > { %p1347_p8 = pneg %p1346_p7 }
 0x2b8   : > { %p1352_p12 = pnand %p1351_p11, %p1347_p8 }
 0x2ba   : > { %1355 = shalt.err (!%p1352_p12)
}
 0x2bb   : > { %s1401_s28 = smov 128   ;;  %s1402_s29 = smov 8  }
 0x2bc   : > { %1220 = dma.vmem_to_hbm [thread:$0]  (%p1456_p5), %s1990_s5, 1024, %s1988_s8, %s1996_s13, %s1401_s28, %s1401_s28, %s1402_s29  }
 0x2bd PF: > { %p1226_p13 = scmp.ge.s32.totalorder %s1390_s12, 2  ;;  %s1140_s30 = sand.u32 1, %s1378_s9  }
 0x2be   : > { %s1141_s3 = scalar_lea.sflag [#allocation3], %s1140_s30 }
 0x2bf   : > { %p1223_p0 = pnand %p1226_p13, %p1460_p6 }
 0x2c1   : > { %p1224_p1 = pneg %p1223_p0 }
 0x2c3   : > { %1373 = dma.done.wait (%p1224_p1), %s1141_s3, 1024  }
 0x2c4   : > { %1375 = vsyncadd (%p1224_p1), %s1141_s3, 4294966272  ;;  %p12_p2 = scmp.ge.s32.totalorder %s1443_s15, 4   ;;  %s2044_s9 = smov %s1382_s10 }
 0x2c5   : > { %s2045_s10 = smov %s1386_s11  ;;  %s2046_s11 = smov %s1454_s18 }
 0x2c6   : > { %s2047_s12 = smov %s1443_s15  ;;  %14 = sbr.rel (!%p12_p2) target bundleno = 3 (0x3), region = 66 }
 0x2cb   :  { %1146 = vsyncpa [#allocation3], 1 }
 0x2cc   :  { %1148 = vsyncpa [#allocation3 + $0x1], 1 }

</bundles_post_ra>
